<compile_context>
chip_gen: v5e
topology: v5e:2x2
jax: 0.10.0
libtpu: 0.0.40
codegen_flags: <defaults>
</compile_context>

<pallas_src>
import math

import jax
import jax.numpy as jnp
from jax.experimental import pallas as pl
from jax.experimental.pallas import tpu as pltpu

T_MIN = 0.05
_LANES = 128
_SUBLANES = 8
_PALLAS_MIN_ELEMS = 1 << 12          # below this, let XLA fuse the divide
_DATA_VMEM_BUDGET = 24 << 20         # review: cap data buffers ~24 MiB (v7x safe)


def _round_up(x: int, m: int) -> int:
    return (x + m - 1) // m * m


def _cdiv(a: int, b: int) -> int:
    return (a + b - 1) // b


def _get_T(t_param, linear: bool):
    t = t_param.astype(jnp.float32)
    if linear:
        return jnp.maximum(t, 0.0) + T_MIN   # relu(T) + T_min
    return jnp.exp(t)                        # exp(T)


def _vmem_capacity_bytes() -> int:
    try:
        return int(pltpu.get_tpu_info().vmem_capacity_bytes)
    except Exception:
        return 64 * 1024 * 1024              # conservative (v7x per-TC VMEM)


def _calibrate_kernel(pat_ref, x_ref, o_ref):
    # pat_ref: (Q, 128) f32 inv_T pattern (one full repetition period, resident)
    # x_ref / o_ref: (BR, 128) logits slab block, BR a static multiple of Q.
    p = pat_ref[...]                                   # (Q, 128) f32
    # TODO(synk): bf16 inputs could skip the f32 upcast on v6e/v7x (bf16 VPU)
    # to halve vreg/VMEM pressure; kept f32 math for parity with PyTorch.
    x = x_ref[...].astype(jnp.float32)                 # (BR, 128)
    q = p.shape[0]
    br = x.shape[0]
    # Split the leading dim at a Q (multiple-of-8) boundary -> layout no-op,
    # then broadcast-multiply the resident pattern over the repetitions.
    y = x.reshape(br // q, q, _LANES) * p[None, :, :]
    o_ref[...] = y.reshape(br, _LANES).astype(o_ref.dtype)


def vector_calibrator_forward(
    logits,
    t_param,
    linear: bool = False,
    *,
    use_pallas=None,
    data_vmem_budget_bytes: int = _DATA_VMEM_BUDGET,
):
    """logits: (N, C) float; t_param: (C,) float32. Returns (N, C), dtype of logits."""
    n, c = logits.shape
    total = n * c

    # Hoisted out of the kernel: exp/relu + reciprocal on C elements (tiny XLA op).
    inv_t = 1.0 / _get_T(t_param, linear)              # (C,) float32

    if use_pallas is None:
        use_pallas = total >= _PALLAS_MIN_ELEMS
    if not use_pallas:
        out = logits.astype(jnp.float32) * inv_t[None, :]
        return out.astype(logits.dtype)

    # ---- lane-dense slab layout -------------------------------------------
    # Period (in 128-lane rows) of the per-element class index along the flat
    # axis; quantum additionally aligns it to the 8-sublane granularity.
    period = c // math.gcd(c, _LANES)                  # 21 for C=21
    quantum = (period * _SUBLANES) // math.gcd(period, _SUBLANES)  # lcm -> 168

    idx = jnp.arange(quantum * _LANES, dtype=jnp.int32) % c
    pattern = inv_t[idx].reshape(quantum, _LANES)      # (Q, 128) f32, ~86 KiB

    r_rows = max(_cdiv(total, _LANES), quantum)        # slab height (>= 1 quantum)
    padded_total = r_rows * _LANES
    flat = logits.reshape(-1)                          # row-major flatten: free
    if padded_total != total:
        # One extra HBM copy for the ragged tail; avoid by using N % 128 == 0.
        flat = jnp.pad(flat, (0, padded_total - total))
    slab = flat.reshape(r_rows, _LANES)

    # ---- block-size selection (VMEM-budget + megacore aware) ---------------
    itemsize = jnp.dtype(logits.dtype).itemsize
    vmem_cap = _vmem_capacity_bytes()
    data_budget = min(vmem_cap // 2, data_vmem_budget_bytes)
    # in + out, each double-buffered: 4 buffers of BR*128*itemsize bytes.
    rows_cap = data_budget // (4 * _LANES * itemsize)
    br_cap = max(quantum, (rows_cap // quantum) * quantum)
    # >= 2 grid steps whenever there is enough data (2-TC split on v7x).
    br = min(br_cap, _round_up(_cdiv(r_rows, 2), quantum))
    br = max(br, quantum)

    grid = (_cdiv(r_rows, br),)
    usage = 4 * br * _LANES * itemsize + 2 * quantum * _LANES * 4
    vmem_limit = int(min(vmem_cap, max(usage + (8 << 20), 32 << 20)))

    out_slab = pl.pallas_call(
        _calibrate_kernel,
        out_shape=jax.ShapeDtypeStruct((r_rows, _LANES), logits.dtype),
        grid_spec=pltpu.PrefetchScalarGridSpec(
            num_scalar_prefetch=0,
            grid=grid,
            in_specs=[
                pl.BlockSpec((quantum, _LANES), lambda i: (0, 0)),   # inv_T pattern
                pl.BlockSpec((br, _LANES), lambda i: (i, 0)),        # logits slab
            ],
            out_specs=pl.BlockSpec((br, _LANES), lambda i: (i, 0)),
        ),
        compiler_params=pltpu.CompilerParams(
            dimension_semantics=("parallel",),       # independent row blocks
            vmem_limit_bytes=vmem_limit,             # headroom for large tiles
        ),
    )(pattern, slab)

    flat_out = out_slab.reshape(-1)
    if padded_total != total:
        flat_out = flat_out[:total]
    return flat_out.reshape(n, c)


if __name__ == "__main__":
    classes = 21
    batch = 8

    # Parameter init matching __init__: T0 = classes * [1/classes];
    # non-linear mode stores log(T0), linear mode stores T0 directly.
    T0 = jnp.full((classes,), 1.0 / classes, dtype=jnp.float32)
    t_param = jnp.log(T0)
    t_lin = T0

    key = jax.random.PRNGKey(0)
    k_small, k_big, k_rag = jax.random.split(key, 3)

    # --- Small case (module default shape), Pallas path forced.
    logits = jax.random.normal(k_small, (batch, classes), dtype=jnp.float32)
    out = jax.block_until_ready(
        vector_calibrator_forward(logits, t_param, linear=False, use_pallas=True)
    )
    expected = logits / jnp.exp(t_param)[None, :]
    assert out.shape == (batch, classes)
    assert jnp.allclose(out, expected, rtol=1e-5, atol=1e-6)

    # Linear mode on the same small input.
    out_lin = jax.block_until_ready(
        vector_calibrator_forward(logits, t_lin, linear=True, use_pallas=True)
    )
    expected_lin = logits / (jnp.maximum(t_lin, 0.0) + T_MIN)[None, :]
    assert jnp.allclose(out_lin, expected_lin, rtol=1e-5, atol=1e-6)

    # --- Multi-block case: N multiple of 128 -> zero-copy lane-dense path,
    #     grid has >=2 steps (exercises the pipelined / parallel row grid).
    n_big = 2048
    logits_big = jax.random.normal(k_big, (n_big, classes), dtype=jnp.float32)
    out_big = jax.block_until_ready(
        vector_calibrator_forward(logits_big, t_param, linear=False, use_pallas=True)
    )
    expected_big = logits_big / jnp.exp(t_param)[None, :]
    assert out_big.shape == (n_big, classes)
    assert jnp.allclose(out_big, expected_big, rtol=1e-5, atol=1e-6)

    # --- Ragged case: N*C not a multiple of 128 -> wrapper pad/slice path.
    n_rag = 1000
    logits_rag = jax.random.normal(k_rag, (n_rag, classes), dtype=jnp.float32)
    out_rag = jax.block_until_ready(
        vector_calibrator_forward(logits_rag, t_param, linear=False, use_pallas=True)
    )
    expected_rag = logits_rag / jnp.exp(t_param)[None, :]
    assert out_rag.shape == (n_rag, classes)
    assert jnp.allclose(out_rag, expected_rag, rtol=1e-5, atol=1e-6)

    print("KERNEL_OK")
</pallas_src>

<mosaic_0001>
module attributes {stable_mosaic.version = 11 : i64} {
  func.func @_calibrate_kernel(%arg0: i32, %arg1: memref<168x128xf32, #tpu.memory_space<vmem>>, %arg2: memref<168x128xf32, #tpu.memory_space<vmem>>, %arg3: memref<168x128xf32, #tpu.memory_space<vmem>>) attributes {dimension_semantics = [#tpu.dimension_semantics<parallel>], iteration_bounds = array<i64: 1>, scalar_prefetch = 0 : i64, scratch_operands = 0 : i64, tpu.core_type = #tpu.core_type<tc>, window_params = [{pipeline_mode = #tpu.pipeline_mode<synchronous>, transform_indices = @transform_0, window_bounds = array<i64: 168, 128>}, {transform_indices = @transform_1, window_bounds = array<i64: 168, 128>}, {transform_indices = @transform_2, window_bounds = array<i64: 168, 128>}]} {
    %c0 = arith.constant 0 : index
    %c0_0 = arith.constant 0 : index
    %0 = vector.load %arg1[%c0, %c0_0] : memref<168x128xf32, #tpu.memory_space<vmem>>, vector<168x128xf32>
    %c0_1 = arith.constant 0 : index
    %c0_2 = arith.constant 0 : index
    %1 = vector.load %arg2[%c0_1, %c0_2] : memref<168x128xf32, #tpu.memory_space<vmem>>, vector<168x128xf32>
    %2 = vector.shape_cast %1 : vector<168x128xf32> to vector<1x168x128xf32>
    %3 = vector.shape_cast %0 : vector<168x128xf32> to vector<1x168x128xf32>
    %4 = arith.mulf %2, %3 : vector<1x168x128xf32>
    %5 = vector.shape_cast %4 : vector<1x168x128xf32> to vector<168x128xf32>
    %c0_3 = arith.constant 0 : index
    %c0_4 = arith.constant 0 : index
    %6 = vector.load %arg3[%c0_3, %c0_4] : memref<168x128xf32, #tpu.memory_space<vmem>>, vector<168x128xf32>
    tpu.vector_store %arg3[%c0_3, %c0_4], %5 {strides = array<i32>} : memref<168x128xf32, #tpu.memory_space<vmem>>, vector<168x128xf32>,
    return
  }
  func.func @transform_0(%arg0: i32) -> (i32, i32) {
    %c0_i32 = arith.constant 0 : i32
    %c0_i32_0 = arith.constant 0 : i32
    %c0_i32_1 = arith.constant 0 : i32
    return %c0_i32, %c0_i32_0 : i32, i32
  }
  func.func @transform_1(%arg0: i32) -> (i32, i32) {
    %c0_i32 = arith.constant 0 : i32
    %c0_i32_0 = arith.constant 0 : i32
    return %arg0, %c0_i32 : i32, i32
  }
  func.func @transform_2(%arg0: i32) -> (i32, i32) {
    %c0_i32 = arith.constant 0 : i32
    %c0_i32_0 = arith.constant 0 : i32
    return %arg0, %c0_i32 : i32, i32
  }
}

</mosaic_0001>

<bundles_post_ra>
// kernel: tpu_custom_call.1
= control target key start
LH: loop header
LB: loop body
LE: loop exit
PB: predicated region body
PF: predicated region fallthrough
CT: control target
= control target key end

     0   :  { %7 = vsyncpa [#allocation3], 0  ;;  %s269_s0 = inlined_call_operand.hbm [shape: f32[168,128], index: 0, kind: input, shape index: {}]   ;;  %s270_s1 = inlined_call_operand.hbm [shape: f32[168,128], index: 1, kind: input, shape index: {}]   ;;  %s271_s2 = inlined_call_operand.hbm [shape: f32[168,128], index: 2, kind: output, shape index: {}]  }
   0x1   :  { %8 = vsyncpa [#allocation6], 0 }
   0x2   :  { %9 = vsyncpa [#allocation4], 0  ;;  %s14_s11 = sshll.u32 %s269_s0, 4  ;;  %s231_s12 = smov [#allocation2]   ;;  %s15_s11 = int_to_ptr.hbm [resolvable:$true] %s14_s11 }
   0x3   :  { %s16_s13 = sshll.u32 %s231_s12, 4  ;;  %s27_s16 = sshll.u32 %s270_s1, 4  ;;  %s17_s13 = int_to_ptr.vmem [resolvable:$true] %s16_s13  ;;  %s28_s16 = int_to_ptr.hbm [resolvable:$true] %s27_s16 }
   0x4   :  { %s232_s17 = smov 128   ;;  %s233_s18 = smov 8  }
   0x5   :  { %22 = dma.hbm_to_vmem [thread:$0]  %s15_s11, 2688, %s17_s13, [#allocation3], %s232_s17, %s232_s17, %s233_s18  }
   0x6   :  { %s234_s19 = smov [#allocation5]  }
   0x7   :  { %s29_s20 = sshll.u32 %s234_s19, 4  ;;  %s30_s20 = int_to_ptr.vmem [resolvable:$true] %s29_s20 }
   0x8   :  { %35 = dma.hbm_to_vmem [thread:$0]  %s28_s16, 2688, %s30_s20, [#allocation6], %s232_s17, %s232_s17, %s233_s18  }
   0x9   :  { %225 = dma.done.wait [#allocation3], 2688  }
   0xa   :  { %226 = vsyncadd [#allocation3], 4294964608 }
   0xb   :  { %227 = dma.done.wait [#allocation6], 2688  }
   0xc   :  { %228 = vsyncadd [#allocation6], 4294964608  ;;  %v44_v0 = vld [vmem:[#allocation2] sm:$0xff]  ;;  %v65_v1 = vld [vmem:[#allocation5] sm:$0xff]  ;;  %s235_s0 = smov [#allocation7]   ;;  %s134_s23 = sshll.u32 %s271_s2, 4  ;;  %s135_s23 = int_to_ptr.hbm [resolvable:$true] %s134_s23 }
   0xd   :  { %v45_v2 = vld [vmem:[#allocation2 + $0x8] sm:$0xff]  ;;  %v86_v3 = vmul.f32 %v65_v1, %v44_v0  ;;  %v66_v4 = vld [vmem:[#allocation5 + $0x8] sm:$0xff]  ;;  %v67_v6 = vld [vmem:[#allocation5 + $0x10] sm:$0xff]  ;;  %s132_s1 = sshll.u32 %s235_s0, 4  ;;  %s133_s1 = int_to_ptr.vmem [resolvable:$true] %s132_s1 }
   0xe   :  { %v46_v5 = vld [vmem:[#allocation2 + $0x10] sm:$0xff]  ;;  %v87_v7 = vmul.f32 %v66_v4, %v45_v2  ;;  %v47_v9 = vld [vmem:[#allocation2 + $0x18] sm:$0xff]  ;;  %v68_v10 = vld [vmem:[#allocation5 + $0x18] sm:$0xff] }
   0xf   :  { %v88_v8 = vmul.f32 %v67_v6, %v46_v5  ;;  %v48_v11 = vld [vmem:[#allocation2 + $0x20] sm:$0xff]  ;;  %107 = vst [vmem:[#allocation7] sm:$0xff] %v86_v3  ;;  %v89_v12 = vmul.f32 %v68_v10, %v47_v9  ;;  %v69_v13 = vld [vmem:[#allocation5 + $0x20] sm:$0xff]  ;;  %v70_v15 = vld [vmem:[#allocation5 + $0x28] sm:$0xff] }
  0x10   :  { %v49_v14 = vld [vmem:[#allocation2 + $0x28] sm:$0xff]  ;;  %108 = vst [vmem:[#allocation7 + $0x8] sm:$0xff] %v87_v7  ;;  %v90_v16 = vmul.f32 %v69_v13, %v48_v11  ;;  %v50_v18 = vld [vmem:[#allocation2 + $0x30] sm:$0xff]  ;;  %v71_v19 = vld [vmem:[#allocation5 + $0x30] sm:$0xff] }
  0x11   :  { %v91_v17 = vmul.f32 %v70_v15, %v49_v14  ;;  %v51_v20 = vld [vmem:[#allocation2 + $0x38] sm:$0xff]  ;;  %109 = vst [vmem:[#allocation7 + $0x10] sm:$0xff] %v88_v8  ;;  %v92_v21 = vmul.f32 %v71_v19, %v50_v18  ;;  %v72_v22 = vld [vmem:[#allocation5 + $0x38] sm:$0xff]  ;;  %v73_v24 = vld [vmem:[#allocation5 + $0x40] sm:$0xff] }
  0x12   :  { %v52_v23 = vld [vmem:[#allocation2 + $0x40] sm:$0xff]  ;;  %110 = vst [vmem:[#allocation7 + $0x18] sm:$0xff] %v89_v12  ;;  %v93_v25 = vmul.f32 %v72_v22, %v51_v20  ;;  %v53_v26 = vld [vmem:[#allocation2 + $0x48] sm:$0xff]  ;;  %v74_v27 = vld [vmem:[#allocation5 + $0x48] sm:$0xff] }
  0x13   :  { %v54_v28 = vld [vmem:[#allocation2 + $0x50] sm:$0xff]  ;;  %111 = vst [vmem:[#allocation7 + $0x20] sm:$0xff] %v90_v16  ;;  %v94_v29 = vmul.f32 %v73_v24, %v52_v23  ;;  %v75_v30 = vld [vmem:[#allocation5 + $0x50] sm:$0xff]  ;;  %v76_v32 = vld [vmem:[#allocation5 + $0x58] sm:$0xff]  ;;  %v95_v33 = vmul.f32 %v74_v27, %v53_v26 }
  0x14   :  { %v55_v31 = vld [vmem:[#allocation2 + $0x58] sm:$0xff]  ;;  %112 = vst [vmem:[#allocation7 + $0x28] sm:$0xff] %v91_v17  ;;  %v56_v34 = vld [vmem:[#allocation2 + $0x60] sm:$0xff]  ;;  %v77_v35 = vld [vmem:[#allocation5 + $0x60] sm:$0xff]  ;;  %v96_v36 = vmul.f32 %v75_v30, %v54_v28 }
  0x15   :  { %113 = vst [vmem:[#allocation7 + $0x30] sm:$0xff] %v92_v21  ;;  %v57_v37 = vld [vmem:[#allocation2 + $0x68] sm:$0xff]  ;;  %v78_v38 = vld [vmem:[#allocation5 + $0x68] sm:$0xff]  ;;  %v97_v39 = vmul.f32 %v76_v32, %v55_v31  ;;  %v79_v41 = vld [vmem:[#allocation5 + $0x70] sm:$0xff]  ;;  %v98_v42 = vmul.f32 %v77_v35, %v56_v34 }
  0x16   :  { %114 = vst [vmem:[#allocation7 + $0x38] sm:$0xff] %v93_v25  ;;  %v58_v40 = vld [vmem:[#allocation2 + $0x70] sm:$0xff]  ;;  %v59_v43 = vld [vmem:[#allocation2 + $0x78] sm:$0xff]  ;;  %v80_v44 = vld [vmem:[#allocation5 + $0x78] sm:$0xff]  ;;  %v99_v45 = vmul.f32 %v78_v38, %v57_v37 }
  0x17   :  { %115 = vst [vmem:[#allocation7 + $0x40] sm:$0xff] %v94_v29  ;;  %v60_v46 = vld [vmem:[#allocation2 + $0x80] sm:$0xff]  ;;  %v81_v47 = vld [vmem:[#allocation5 + $0x80] sm:$0xff]  ;;  %v100_v48 = vmul.f32 %v79_v41, %v58_v40  ;;  %v82_v50 = vld [vmem:[#allocation5 + $0x88] sm:$0xff]  ;;  %v101_v51 = vmul.f32 %v80_v44, %v59_v43 }
  0x18   :  { %116 = vst [vmem:[#allocation7 + $0x48] sm:$0xff] %v95_v33  ;;  %v61_v49 = vld [vmem:[#allocation2 + $0x88] sm:$0xff]  ;;  %v62_v52 = vld [vmem:[#allocation2 + $0x90] sm:$0xff]  ;;  %v83_v53 = vld [vmem:[#allocation5 + $0x90] sm:$0xff]  ;;  %v102_v54 = vmul.f32 %v81_v47, %v60_v46 }
  0x19   :  { %117 = vst [vmem:[#allocation7 + $0x50] sm:$0xff] %v96_v36  ;;  %v63_v55 = vld [vmem:[#allocation2 + $0x98] sm:$0xff]  ;;  %v84_v56 = vld [vmem:[#allocation5 + $0x98] sm:$0xff]  ;;  %v103_v57 = vmul.f32 %v82_v50, %v61_v49  ;;  %v85_v59 = vld [vmem:[#allocation5 + $0xa0] sm:$0xff]  ;;  %v104_v60 = vmul.f32 %v83_v53, %v62_v52 }
  0x1a   :  { %118 = vst [vmem:[#allocation7 + $0x58] sm:$0xff] %v97_v39  ;;  %v64_v58 = vld [vmem:[#allocation2 + $0xa0] sm:$0xff]  ;;  %v105_v61 = vmul.f32 %v84_v56, %v63_v55 }
  0x1b   :  { %119 = vst [vmem:[#allocation7 + $0x60] sm:$0xff] %v98_v42  ;;  %v106_v62 = vmul.f32 %v85_v59, %v64_v58 }
  0x1c   :  { %120 = vst [vmem:[#allocation7 + $0x68] sm:$0xff] %v99_v45 }
  0x1d   :  { %121 = vst [vmem:[#allocation7 + $0x70] sm:$0xff] %v100_v48 }
  0x1e   :  { %122 = vst [vmem:[#allocation7 + $0x78] sm:$0xff] %v101_v51 }
  0x1f   :  { %123 = vst [vmem:[#allocation7 + $0x80] sm:$0xff] %v102_v54 }
  0x20   :  { %124 = vst [vmem:[#allocation7 + $0x88] sm:$0xff] %v103_v57 }
  0x21   :  { %125 = vst [vmem:[#allocation7 + $0x90] sm:$0xff] %v104_v60 }
  0x22   :  { %126 = vst [vmem:[#allocation7 + $0x98] sm:$0xff] %v105_v61 }
  0x23   :  { %127 = vst [vmem:[#allocation7 + $0xa0] sm:$0xff] %v106_v62 }
  0x24   :  { %140 = dma.vmem_to_hbm [thread:$0]  %s133_s1, 2688, %s135_s23, [#allocation4], %s232_s17, %s232_s17, %s233_s18  }
  0x25   :  { %229 = dma.done.wait [#allocation4], 2688  }
  0x26   :  { %230 = vsyncadd [#allocation4], 4294964608 }
  0x27   :  { %145 = vsyncpa [#allocation3], 1 }
  0x28   :  { %146 = vsyncpa [#allocation6], 1 }
  0x29   :  { %147 = vsyncpa [#allocation4], 1 }

</bundles_post_ra>
